<compile_context>
chip_gen: v7x
topology: tpu7x:2x2x1
jax: 0.10.0
libtpu: 0.0.40
codegen_flags: <defaults>
</compile_context>

<pallas_src>
import functools

import jax
import jax.numpy as jnp
from jax.experimental import pallas as pl
from jax.experimental.pallas import tpu as pltpu

_LANES = 128
_MIN_SPLIT_ROWS = 1024  # ~128K elements per block before a grid split pays off


def _wmse_kernel(o_ref, t_ref, w_ref, num_ref, cnt_ref, *,
                 total_rows, block_rows, has_row_tail):
    o = o_ref[...].astype(jnp.float32)
    t = t_ref[...].astype(jnp.float32)
    w = w_ref[...].astype(jnp.float32)

    d = o - t
    wl = d * d * w                        # weighted squared error
    pos = (w > 0).astype(jnp.float32)     # count of weight > 0

    if has_row_tail:
        # Only compiled in when rows % block_rows != 0.  Row-level mask (no
        # per-element flat-index math, no int32-overflow risk); mask the
        # product itself since OOB garbage rows may contain NaN/Inf.
        i = pl.program_id(0)
        rows, lanes = o.shape
        row_idx = jax.lax.broadcasted_iota(jnp.int32, (rows, lanes), 0)
        valid = (i * block_rows + row_idx) < total_rows
        wl = jnp.where(valid, wl, 0.0)
        pos = jnp.where(valid, pos, 0.0)

    # Per-lane partial sums (sublane reduce only); the scalar reduce over the
    # tiny (grid, 128) partials happens in the wrapper.
    num_ref[...] = jnp.sum(wl, axis=0, keepdims=True)
    cnt_ref[...] = jnp.sum(pos, axis=0, keepdims=True)


def _choose_block_rows(rows, max_block_rows):
    """Sublane-aligned block size with an even grid (v7x megacore) and small
    per-step fixed overhead."""
    if rows <= 2 * _MIN_SPLIT_ROWS:
        return rows                       # single full-extent block
    nblocks = max(2, pl.cdiv(rows, max_block_rows))
    if nblocks % 2:
        nblocks += 1                      # even split across v7x's two TCs
    br = pl.cdiv(rows, nblocks)
    br = ((br + 7) // 8) * 8              # (8, 128) sublane rule
    return min(br, rows)


def weighted_mse_loss(out, target, weight, *, max_block_rows=8192):
    """Matches Weighted_MSELoss.forward(out, target, weight)."""
    # TODO(synk): the PyTorch runtime `assert (weight >= 0).all()` is a
    # data-dependent host assert with no clean traced equivalent; not
    # reproduced (the zero-weight guard below relies on it).
    assert out.shape == target.shape
    # No-op when weight already matches out.shape (the module's usual case).
    weight = jnp.broadcast_to(weight, out.shape)

    n = int(out.size)
    of = out.reshape(-1)
    tf = target.reshape(-1)
    wf = weight.reshape(-1)

    # Lane tail (< 128 elements): reduce with plain jnp instead of padding all
    # three tensors (pad would roughly double HBM traffic when it triggers).
    n_aligned = (n // _LANES) * _LANES
    if n_aligned != n:
        o_t = of[n_aligned:].astype(jnp.float32)
        t_t = tf[n_aligned:].astype(jnp.float32)
        w_t = wf[n_aligned:].astype(jnp.float32)
        d_t = o_t - t_t
        tail_num = jnp.sum(d_t * d_t * w_t)
        tail_cnt = jnp.sum((w_t > 0).astype(jnp.float32))
    else:
        tail_num = jnp.float32(0.0)
        tail_cnt = jnp.float32(0.0)

    rows = n_aligned // _LANES
    if rows == 0:
        loss_sum = tail_num
        pos_cnt = tail_cnt
    else:
        o2 = of[:n_aligned].reshape(rows, _LANES)
        t2 = tf[:n_aligned].reshape(rows, _LANES)
        w2 = wf[:n_aligned].reshape(rows, _LANES)

        block_rows = _choose_block_rows(rows, max_block_rows)
        grid = (pl.cdiv(rows, block_rows),)
        has_row_tail = (rows % block_rows) != 0

        kernel = functools.partial(
            _wmse_kernel, total_rows=rows, block_rows=block_rows,
            has_row_tail=has_row_tail)

        in_spec = pl.BlockSpec((block_rows, _LANES), lambda i: (i, 0))
        out_spec = pl.BlockSpec((1, _LANES), lambda i: (i, 0))
        part_shape = jax.ShapeDtypeStruct((grid[0], _LANES), jnp.float32)

        # Double-buffered footprint of the three input tiles (+ slack), capped
        # inside v7x's 64 MiB physical VMEM.
        in_bytes = sum(jnp.dtype(a.dtype).itemsize for a in (o2, t2, w2))
        need = 2 * block_rows * _LANES * in_bytes + (2 << 20)
        vmem_limit = int(min(max(need, 32 * 1024 * 1024), 56 * 1024 * 1024))

        num_p, cnt_p = pl.pallas_call(
            kernel,
            out_shape=(part_shape, part_shape),
            grid_spec=pltpu.PrefetchScalarGridSpec(
                num_scalar_prefetch=0,
                grid=grid,
                in_specs=[in_spec, in_spec, in_spec],
                out_specs=(out_spec, out_spec),
            ),
            compiler_params=pltpu.CompilerParams(
                dimension_semantics=("parallel",),
                vmem_limit_bytes=vmem_limit),
        )(o2, t2, w2)

        loss_sum = jnp.sum(num_p) + tail_num
        pos_cnt = jnp.sum(cnt_p) + tail_cnt

    # weight >= 0 (asserted by the original module), so weight.sum() > 0
    # iff (weight > 0).sum() > 0 — only the positive-count stream is needed.
    denom = jnp.where(pos_cnt > 0, pos_cnt, 1.0)
    return jnp.where(pos_cnt > 0, loss_sum / denom, loss_sum * 0.0)


def _reference(out, target, weight):
    # Pure-JAX reference mirroring the PyTorch forward.
    o = out.astype(jnp.float32)
    t = target.astype(jnp.float32)
    w = weight.astype(jnp.float32)
    loss = (o - t) ** 2 * w
    total = jnp.sum(loss)
    pos = jnp.sum((w > 0).astype(jnp.float32))
    safe = jnp.where(pos > 0, pos, 1.0)
    return jnp.where(jnp.sum(w) > 0, total / safe, total * 0.0)


if __name__ == "__main__":
    key = jax.random.PRNGKey(0)
    k1, k2, k3 = jax.random.split(key, 3)

    # Center-map-like shapes: (B, C, H, W).
    B, C, H, W = 2, 4, 16, 16
    out = jax.random.normal(k1, (B, C, H, W), dtype=jnp.float32)
    target = jax.random.normal(k2, (B, C, H, W), dtype=jnp.float32)
    # Instance-aware guidance weight: non-negative, with exact zeros.
    weight = jnp.maximum(jax.random.normal(k3, (B, C, H, W), dtype=jnp.float32), 0.0)

    loss = jax.block_until_ready(weighted_mse_loss(out, target, weight))
    ref = _reference(out, target, weight)
    assert jnp.allclose(loss, ref, atol=1e-6, rtol=1e-4), (loss, ref)

    # All-zero-weight branch (returns 0).
    loss0 = jax.block_until_ready(
        weighted_mse_loss(out, target, jnp.zeros_like(weight)))
    assert jnp.allclose(loss0, 0.0), loss0

    # Lane-unaligned size (exercises the wrapper-side tail path, no pad).
    k4, k5, k6 = jax.random.split(jax.random.PRNGKey(1), 3)
    shp = (2, 3, 17, 19)  # 1938 elements, not a multiple of 128
    ou = jax.random.normal(k4, shp, dtype=jnp.float32)
    tu = jax.random.normal(k5, shp, dtype=jnp.float32)
    wu = jnp.maximum(jax.random.normal(k6, shp, dtype=jnp.float32), 0.0)
    lu = jax.block_until_ready(weighted_mse_loss(ou, tu, wu))
    ru = _reference(ou, tu, wu)
    assert jnp.allclose(lu, ru, atol=1e-6, rtol=1e-4), (lu, ru)

    # Row-unaligned medium size (exercises the in-kernel last-block row mask
    # and the 2-way grid split).
    k7, k8, k9 = jax.random.split(jax.random.PRNGKey(2), 3)
    shp2 = (4100, 128)
    om = jax.random.normal(k7, shp2, dtype=jnp.float32)
    tm_ = jax.random.normal(k8, shp2, dtype=jnp.float32)
    wm = jnp.maximum(jax.random.normal(k9, shp2, dtype=jnp.float32), 0.0)
    lm = jax.block_until_ready(weighted_mse_loss(om, tm_, wm))
    rm = _reference(om, tm_, wm)
    assert jnp.allclose(lm, rm, atol=1e-5, rtol=1e-4), (lm, rm)

    print("KERNEL_OK")
</pallas_src>

<mosaic_0001>
module attributes {stable_mosaic.version = 11 : i64} {
  func.func @_wmse_kernel(%arg0: i32, %arg1: memref<16x128xf32, #tpu.memory_space<vmem>>, %arg2: memref<16x128xf32, #tpu.memory_space<vmem>>, %arg3: memref<16x128xf32, #tpu.memory_space<vmem>>, %arg4: memref<1x128xf32, #tpu.memory_space<vmem>>, %arg5: memref<1x128xf32, #tpu.memory_space<vmem>>) attributes {dimension_semantics = [#tpu.dimension_semantics<parallel>], iteration_bounds = array<i64: 1>, scalar_prefetch = 0 : i64, scratch_operands = 0 : i64, tpu.core_type = #tpu.core_type<tc>, window_params = [{transform_indices = @transform_0, window_bounds = array<i64: 16, 128>}, {transform_indices = @transform_1, window_bounds = array<i64: 16, 128>}, {transform_indices = @transform_2, window_bounds = array<i64: 16, 128>}, {transform_indices = @transform_3, window_bounds = array<i64: 1, 128>}, {transform_indices = @transform_4, window_bounds = array<i64: 1, 128>}]} {
    %c0 = arith.constant 0 : index
    %c0_0 = arith.constant 0 : index
    %0 = vector.load %arg1[%c0, %c0_0] : memref<16x128xf32, #tpu.memory_space<vmem>>, vector<16x128xf32>
    %c0_1 = arith.constant 0 : index
    %c0_2 = arith.constant 0 : index
    %1 = vector.load %arg2[%c0_1, %c0_2] : memref<16x128xf32, #tpu.memory_space<vmem>>, vector<16x128xf32>
    %c0_3 = arith.constant 0 : index
    %c0_4 = arith.constant 0 : index
    %2 = vector.load %arg3[%c0_3, %c0_4] : memref<16x128xf32, #tpu.memory_space<vmem>>, vector<16x128xf32>
    %3 = arith.subf %0, %1 : vector<16x128xf32>
    %4 = arith.mulf %3, %3 : vector<16x128xf32>
    %5 = arith.mulf %4, %2 : vector<16x128xf32>
    %cst = arith.constant 0.000000e+00 : f32
    %6 = vector.broadcast %cst : f32 to vector<16x128xf32>
    %7 = arith.cmpf ogt, %2, %6 : vector<16x128xf32>
    %8 = arith.extui %7 : vector<16x128xi1> to vector<16x128xi32>
    %9 = arith.sitofp %8 : vector<16x128xi32> to vector<16x128xf32>
    %cst_5 = arith.constant dense<0.000000e+00> : vector<128xf32>
    %10 = vector.multi_reduction <add>, %5, %cst_5 [0] : vector<16x128xf32> to vector<128xf32>
    %11 = vector.shape_cast %10 : vector<128xf32> to vector<1x128xf32>
    %c0_6 = arith.constant 0 : index
    %c0_7 = arith.constant 0 : index
    %12 = vector.load %arg4[%c0_6, %c0_7] : memref<1x128xf32, #tpu.memory_space<vmem>>, vector<1x128xf32>
    tpu.vector_store %arg4[%c0_6, %c0_7], %11 {strides = array<i32>} : memref<1x128xf32, #tpu.memory_space<vmem>>, vector<1x128xf32>,
    %cst_8 = arith.constant dense<0.000000e+00> : vector<128xf32>
    %13 = vector.multi_reduction <add>, %9, %cst_8 [0] : vector<16x128xf32> to vector<128xf32>
    %14 = vector.shape_cast %13 : vector<128xf32> to vector<1x128xf32>
    %c0_9 = arith.constant 0 : index
    %c0_10 = arith.constant 0 : index
    %15 = vector.load %arg5[%c0_9, %c0_10] : memref<1x128xf32, #tpu.memory_space<vmem>>, vector<1x128xf32>
    tpu.vector_store %arg5[%c0_9, %c0_10], %14 {strides = array<i32>} : memref<1x128xf32, #tpu.memory_space<vmem>>, vector<1x128xf32>,
    return
  }
  func.func @transform_0(%arg0: i32) -> (i32, i32) {
    %c0_i32 = arith.constant 0 : i32
    %c0_i32_0 = arith.constant 0 : i32
    return %arg0, %c0_i32 : i32, i32
  }
  func.func @transform_1(%arg0: i32) -> (i32, i32) {
    %c0_i32 = arith.constant 0 : i32
    %c0_i32_0 = arith.constant 0 : i32
    return %arg0, %c0_i32 : i32, i32
  }
  func.func @transform_2(%arg0: i32) -> (i32, i32) {
    %c0_i32 = arith.constant 0 : i32
    %c0_i32_0 = arith.constant 0 : i32
    return %arg0, %c0_i32 : i32, i32
  }
  func.func @transform_3(%arg0: i32) -> (i32, i32) {
    %c0_i32 = arith.constant 0 : i32
    %c0_i32_0 = arith.constant 0 : i32
    return %arg0, %c0_i32 : i32, i32
  }
  func.func @transform_4(%arg0: i32) -> (i32, i32) {
    %c0_i32 = arith.constant 0 : i32
    %c0_i32_0 = arith.constant 0 : i32
    return %arg0, %c0_i32 : i32, i32
  }
}

</mosaic_0001>

<bundles_post_ra>
// kernel: tpu_custom_call.1
= control target key start
LH: loop header
LB: loop body
LE: loop exit
PB: predicated region body
PF: predicated region fallthrough
CT: control target
= control target key end

     0   :  { %10 = vsyncpa [#allocation3], 0  ;;  %s360_s0 = inlined_call_operand.hbm [shape: f32[16,128], index: 0, kind: input, shape index: {}]   ;;  %s361_s1 = inlined_call_operand.hbm [shape: f32[16,128], index: 1, kind: input, shape index: {}]   ;;  %s362_s2 = inlined_call_operand.hbm [shape: f32[16,128], index: 2, kind: input, shape index: {}]   ;;  %s363_s3 = inlined_call_operand.hbm [shape: f32[1,128], index: 3, kind: output, shape index: {0}]   ;;  %s364_s4 = inlined_call_operand.hbm [shape: f32[1,128], index: 4, kind: output, shape index: {1}]  }
   0x1   :  { %11 = vsyncpa [#allocation6], 0 }
   0x2   :  { %12 = vsyncpa [#allocation4], 0 }
   0x3   :  { %13 = vsyncpa [#allocation10], 0  ;;  %s251_s15 = smov [#allocation5]   ;;  %s252_s17 = smov [#allocation2]  }
   0x4   :  { %s31_s16 = sshll.u32 %s251_s15, 4  ;;  %s19_s18 = sshll.u32 %s252_s17, 4  ;;  %s32_s16 = int_to_ptr.vmem [resolvable:$true] %s31_s16  ;;  %s284_s18 = int_to_ptr.vmem [resolvable:$true] %s19_s18 }
   0x5   :  { %s133_s21 = scalar_lea.hbm %s361_s1, 256 }
   0x6   :  { %p134_p0 = scmp.ne.s32.totalorder %s361_s1, %s133_s21  ;;  %p137_p1 = scmp.lt.u32.totalorder %s133_s21, %s361_s1 }
   0x8   :  { %p139_p2 = pnand %p137_p1, %p134_p0 }
   0xa   :  { %142 = shalt.err (!%p139_p2)
}
   0xb   :  { %s143_s26 = scalar_lea.vmem %s32_s16, 256  ;;  %p148_p4 = scmp.lt.s32.totalorder %s32_s16, %s32_s16 }
   0xc   :  { %p144_p3 = scmp.ne.s32.totalorder %s32_s16, %s143_s26  ;;  %p149_p5 = scmp.lt.s32.totalorder %s143_s26, %s143_s26 }
   0xe   :  { %p150_p6 = por %p149_p5, %p148_p4 }
  0x10   :  { %p151_p7 = pnand %p150_p6, %p144_p3 }
  0x12   :  { %154 = shalt.err (!%p151_p7)
}
  0x13   :  { %s253_s27 = smov 128   ;;  %s254_s28 = smov 8  }
  0x14   :  { %37 = dma.hbm_to_vmem [thread:$0]  %s361_s1, 256, %s32_s16, [#allocation6], %s253_s27, %s253_s27, %s254_s28  }
  0x15   :  { %s155_s7 = scalar_lea.hbm %s360_s0, 256 }
  0x16   :  { %p156_p8 = scmp.ne.s32.totalorder %s360_s0, %s155_s7  ;;  %p159_p9 = scmp.lt.u32.totalorder %s155_s7, %s360_s0 }
  0x18   :  { %p161_p10 = pnand %p159_p9, %p156_p8 }
  0x1a   :  { %164 = shalt.err (!%p161_p10)
}
  0x1b   :  { %s165_s12 = scalar_lea.vmem %s284_s18, 256  ;;  %p170_p12 = scmp.lt.s32.totalorder %s284_s18, %s284_s18 }
  0x1c   :  { %p166_p11 = scmp.ne.s32.totalorder %s284_s18, %s165_s12  ;;  %p171_p13 = scmp.lt.s32.totalorder %s165_s12, %s165_s12 }
  0x1e   :  { %p172_p0 = por %p171_p13, %p170_p12 }
  0x20   :  { %p173_p1 = pnand %p172_p0, %p166_p11 }
  0x22   :  { %176 = shalt.err (!%p173_p1)
}
  0x23   :  { %25 = dma.hbm_to_vmem [thread:$0]  %s360_s0, 256, %s284_s18, [#allocation3], %s253_s27, %s253_s27, %s254_s28  }
  0x24   :  { %s255_s14 = smov [#allocation7]   ;;  %s177_s19 = scalar_lea.hbm %s362_s2, 256 }
  0x25   :  { %s43_s15 = sshll.u32 %s255_s14, 4  ;;  %p178_p2 = scmp.ne.s32.totalorder %s362_s2, %s177_s19  ;;  %s44_s15 = int_to_ptr.vmem [resolvable:$true] %s43_s15 }
  0x26   :  { %p181_p3 = scmp.lt.u32.totalorder %s177_s19, %s362_s2 }
  0x28   :  { %p183_p4 = pnand %p181_p3, %p178_p2 }
  0x2a   :  { %186 = shalt.err (!%p183_p4)
}
  0x2b   :  { %s187_s24 = scalar_lea.vmem %s44_s15, 256  ;;  %p192_p6 = scmp.lt.s32.totalorder %s44_s15, %s44_s15 }
  0x2c   :  { %p188_p5 = scmp.ne.s32.totalorder %s44_s15, %s187_s24  ;;  %p193_p7 = scmp.lt.s32.totalorder %s187_s24, %s187_s24 }
  0x2e   :  { %p194_p8 = por %p193_p7, %p192_p6 }
  0x30   :  { %p195_p9 = pnand %p194_p8, %p188_p5 }
  0x32   :  { %198 = shalt.err (!%p195_p9)
}
  0x33   :  { %49 = dma.hbm_to_vmem [thread:$0]  %s362_s2, 256, %s44_s15, [#allocation6], %s253_s27, %s253_s27, %s254_s28  }
  0x34   :  { %243 = dma.done.wait [#allocation3], 256  }
  0x35   :  { %244 = vsyncadd [#allocation3], 4294967040 }
  0x36   :  { %245 = dma.done.wait [#allocation6], 512  }
  0x37   :  { %246 = vsyncadd [#allocation6], 4294966784  ;;  %v59_v0 = vld [vmem:[#allocation2] sm:$0xff]  ;;  %v60_v1 = vld [vmem:[#allocation2 + $0x8] sm:$0xff]  ;;  %v256_v9 = vmov 0.0   ;;  %s257_s2 = smov [#allocation9]  }
  0x38   :  { %v61_v2 = vld [vmem:[#allocation5] sm:$0xff]  ;;  %v62_v3 = vld [vmem:[#allocation5 + $0x8] sm:$0xff]  ;;  %v63_v4 = vld [vmem:[#allocation7] sm:$0xff]  ;;  %s109_s25 = sshll.u32 %s257_s2, 4  ;;  %s258_s26 = smov [#allocation8]   ;;  %s110_s25 = int_to_ptr.vmem [resolvable:$true] %s109_s25 }
  0x39   :  { %v64_v5 = vld [vmem:[#allocation7 + $0x8] sm:$0xff]  ;;  %v65_v6 = vsub.f32 %v59_v0, %v61_v2  ;;  %v66_v7 = vsub.f32 %v60_v1, %v62_v3  ;;  %vm71_vm0 = vcmp.gt.f32.partialorder %v63_v4, 0.0  ;;  %s99_s27 = sshll.u32 %s258_s26, 4  ;;  %s199_s28 = scalar_lea.vmem %s110_s25, 16  ;;  %s100_s27 = int_to_ptr.vmem [resolvable:$true] %s99_s27 }
  0x3a   :  { %vm72_vm1 = vcmp.gt.f32.partialorder %v64_v5, 0.0  ;;  %v123_v10 = vsel %vm71_vm0, 1.0, %v256_v9  ;;  %p200_p10 = scmp.ne.s32.totalorder %s110_s25, %s199_s28  ;;  %s203_s29 = scalar_lea.vmem %s110_s25, 32 }
  0x3b   :  { %v67_v8 = vmul.f32 %v65_v6, %v65_v6  ;;  %v124_v11 = vsel %vm72_vm1, 1.0, %v256_v9  ;;  %v68_v12 = vmul.f32 %v66_v7, %v66_v7  ;;  %p204_p11 = scmp.lt.s32.totalorder %s110_s25, %s110_s25  ;;  %p205_p12 = scmp.lt.s32.totalorder %s203_s29, %s199_s28 }
  0x3c   :  { %v85_v13 = vadd.f32 %v124_v11, %v123_v10 }
  0x3d   :  { %v69_v14 = vmul.f32 %v67_v8, %v63_v4  ;;  %v70_v15 = vmul.f32 %v68_v12, %v64_v5  ;;  %p206_p13 = por %p205_p12, %p204_p11 }
  0x3e   :  { %v86_v16 = vrot.slane %v85_v13, 4 }
  0x3f   :  { %v77_v17 = vadd.f32 %v70_v15, %v69_v14  ;;  %p207_p0 = pnand %p206_p13, %p200_p10 }
  0x40   :  { %v87_v18 = vadd.f32 %v86_v16, %v85_v13 }
  0x41   :  { %v78_v19 = vrot.slane %v77_v17, 4 }
  0x42   :  { %v88_v20 = vrot.slane %v87_v18, 2 }
  0x43   :  { %v79_v21 = vadd.f32 %v78_v19, %v77_v17 }
  0x44   :  { %v89_v22 = vadd.f32 %v88_v20, %v87_v18 }
  0x45   :  { %v80_v23 = vrot.slane %v79_v21, 2 }
  0x46   :  { %v90_v24 = vrot.slane %v89_v22, 1 }
  0x47   :  { %v81_v25 = vadd.f32 %v80_v23, %v79_v21 }
  0x48   :  { %v91_v26 = vadd.f32 %v90_v24, %v89_v22 }
  0x49   :  { %v82_v27 = vrot.slane %v81_v25, 1 }
  0x4a   :  { %92 = vst [vmem:[#allocation9] sm:$0x1] %v91_v26 }
  0x4b   :  { %210 = shalt.err (!%p207_p0)
}
  0x4c   :  { %s211_s6 = scalar_lea.hbm %s364_s4, 16 }
  0x4d   :  { %p212_p1 = scmp.ne.s32.totalorder %s364_s4, %s211_s6  ;;  %p215_p2 = scmp.lt.u32.totalorder %s211_s6, %s364_s4 }
  0x4f   :  { %p217_p3 = pnand %p215_p2, %p212_p1 }
  0x51   :  { %220 = shalt.err (!%p217_p3)
}
  0x52   :  { %112 = dma.vmem_to_hbm [thread:$0]  %s110_s25, 16, %s364_s4, [#allocation10]   ;;  %v83_v28 = vadd.f32 %v82_v27, %v81_v25 }
  0x53   :  { %s221_s1 = scalar_lea.vmem %s100_s27, 16  ;;  %s225_s13 = scalar_lea.vmem %s100_s27, 32 }
  0x54   :  { %84 = vst [vmem:[#allocation8] sm:$0x1] %v83_v28  ;;  %p222_p4 = scmp.ne.s32.totalorder %s100_s27, %s221_s1  ;;  %p226_p5 = scmp.lt.s32.totalorder %s100_s27, %s100_s27 }
  0x55   :  { %p227_p6 = scmp.lt.s32.totalorder %s225_s13, %s221_s1 }
  0x57   :  { %p228_p7 = por %p227_p6, %p226_p5 }
  0x59   :  { %p229_p8 = pnand %p228_p7, %p222_p4 }
  0x5b   :  { %232 = shalt.err (!%p229_p8)
}
  0x5c   :  { %s233_s16 = scalar_lea.hbm %s363_s3, 16 }
  0x5d   :  { %p234_p9 = scmp.ne.s32.totalorder %s363_s3, %s233_s16  ;;  %p237_p10 = scmp.lt.u32.totalorder %s233_s16, %s363_s3 }
  0x5f   :  { %p239_p11 = pnand %p237_p10, %p234_p9 }
  0x61   :  { %242 = shalt.err (!%p239_p11)
}
  0x62   :  { %102 = dma.vmem_to_hbm [thread:$0]  %s100_s27, 16, %s363_s3, [#allocation4]  }
  0x63   :  { %247 = dma.done.wait [#allocation4], 16  }
  0x64   :  { %248 = vsyncadd [#allocation4], 4294967280 }
  0x65   :  { %249 = dma.done.wait [#allocation10], 16  }
  0x66   :  { %250 = vsyncadd [#allocation10], 4294967280 }
  0x67   :  { %119 = vsyncpa [#allocation3], 1 }
  0x68   :  { %120 = vsyncpa [#allocation6], 1 }
  0x69   :  { %121 = vsyncpa [#allocation4], 1 }
  0x6a   :  { %122 = vsyncpa [#allocation10], 1 }

</bundles_post_ra>
